<compile_context>
chip_gen: v5e
topology: v5e:2x2
jax: 0.10.0
libtpu: 0.0.40
codegen_flags: <defaults>
</compile_context>

<pallas_src>
import functools

import jax
import jax.numpy as jnp
import numpy as np
from jax import lax
from jax.experimental import pallas as pl
from jax.experimental.pallas import tpu as pltpu


def _edge_attention_kernel(w_ref, b_ref, x_ref, out_ref, *, H, W):
    # w_ref:   (C, 9)      f32 VMEM   conv weight, tap index = (dy+1)*3 + (dx+1)
    # b_ref:   (1,)        f32 SMEM   conv bias
    # x_ref:   (1, C, H*W) VMEM       one batch element, spatial dims flattened
    # out_ref: (1, C, H*W) VMEM
    C = x_ref.shape[1]
    HW = H * W

    x = x_ref[0].astype(jnp.float32)                       # (C, HW) — loaded/cast once

    # Flattened-pixel coordinates used to mask out the zero-padding region.
    pos = lax.broadcasted_iota(jnp.int32, (1, HW), 1)       # 0 .. HW-1
    col = pos % W                                           # x-coordinate of each pixel

    acc = jnp.zeros((C, HW), dtype=jnp.float32)             # weighted per-channel taps
    for dy in (-1, 0, 1):
        for dx in (-1, 0, 1):
            tap = (dy + 1) * 3 + (dx + 1)
            w_col = w_ref[:, tap:tap + 1].astype(jnp.float32)   # (C, 1)

            offset = dy * W + dx
            if offset == 0:
                shifted = x
            else:
                # shifted[p] = x[p + offset] (wraps; wrapped lanes are masked below)
                shifted = pltpu.roll(x, shift=(-offset) % HW, axis=1)

            # Zero-padding mask: source pixel (row+dy, col+dx) must be in-bounds.
            mask = None
            if dy == -1:
                mask = pos >= W
            elif dy == 1:
                mask = pos < (H - 1) * W
            if dx == -1:
                m = col >= 1
                mask = m if mask is None else jnp.logical_and(mask, m)
            elif dx == 1:
                m = col <= W - 2
                mask = m if mask is None else jnp.logical_and(mask, m)
            if mask is not None:
                shifted = jnp.where(mask, shifted, 0.0)

            acc = acc + shifted * w_col

    logits = jnp.sum(acc, axis=0, keepdims=True) + b_ref[0]  # (1, HW) — single C-reduce
    att = jax.nn.sigmoid(logits)
    out_ref[0] = (x * att).astype(out_ref.dtype)


def adaptive_edge_attention(x, weight, bias):
    """x: (N, C, H, W); weight: (1, C, 3, 3); bias: (1,). Returns (N, C, H, W)."""
    N, C, H, W = x.shape
    HW = H * W

    xf = x.reshape(N, C, HW)                               # lane-dense last dim
    w2 = weight.astype(jnp.float32).reshape(C, 9)          # [c, (dy+1)*3 + (dx+1)]
    b = bias.astype(jnp.float32).reshape(1)

    kernel = functools.partial(_edge_attention_kernel, H=H, W=W)

    out_flat = pl.pallas_call(
        kernel,
        out_shape=jax.ShapeDtypeStruct((N, C, HW), x.dtype),
        grid=(N,),
        in_specs=[
            pl.BlockSpec((C, 9), lambda n: (0, 0)),          # conv weight (whole, VMEM)
            pl.BlockSpec(memory_space=pltpu.SMEM),           # bias scalar
            pl.BlockSpec((1, C, HW), lambda n: (n, 0, 0)),   # x (flattened spatial)
        ],
        out_specs=pl.BlockSpec((1, C, HW), lambda n: (n, 0, 0)),
        compiler_params=pltpu.CompilerParams(
            dimension_semantics=("parallel",)),
    )(w2, b, xf)

    return out_flat.reshape(N, C, H, W)


def _reference(x, weight, bias):
    logits = lax.conv_general_dilated(
        x.astype(jnp.float32), weight.astype(jnp.float32),
        window_strides=(1, 1), padding="SAME",
        dimension_numbers=("NCHW", "OIHW", "NCHW"),
    ) + bias.reshape(1, 1, 1, 1)
    return x * jax.nn.sigmoid(logits)


if __name__ == "__main__":
    key = jax.random.PRNGKey(0)
    kx, kw, kb = jax.random.split(key, 3)

    N, C, H, W = 2, 4, 16, 16
    x = jax.random.normal(kx, (N, C, H, W), dtype=jnp.float32)
    # Deterministic synthetic parameters (Conv2d(C, 1, 3, padding=1)):
    weight = 0.1 * jax.random.normal(kw, (1, C, 3, 3), dtype=jnp.float32)
    bias = 0.1 * jax.random.normal(kb, (1,), dtype=jnp.float32)

    out = jax.block_until_ready(adaptive_edge_attention(x, weight, bias))

    ref = jax.block_until_ready(_reference(x, weight, bias))
    assert out.shape == (N, C, H, W)
    np.testing.assert_allclose(np.asarray(out), np.asarray(ref), rtol=1e-5, atol=1e-5)

    print("KERNEL_OK")
</pallas_src>

<mosaic_0001>
module attributes {stable_mosaic.version = 11 : i64} {
  func.func @_edge_attention_kernel(%arg0: i32, %arg1: memref<4x9xf32, #tpu.memory_space<vmem>>, %arg2: memref<1xf32, #tpu.memory_space<smem>>, %arg3: memref<1x4x256xf32, #tpu.memory_space<vmem>>, %arg4: memref<1x4x256xf32, #tpu.memory_space<vmem>>) attributes {dimension_semantics = [#tpu.dimension_semantics<parallel>], iteration_bounds = array<i64: 2>, scalar_prefetch = 0 : i64, scratch_operands = 0 : i64, tpu.core_type = #tpu.core_type<tc>, window_params = [{pipeline_mode = #tpu.pipeline_mode<synchronous>, transform_indices = @transform_0, window_bounds = array<i64: 4, 9>}, {transform_indices = @transform_1, window_bounds = array<i64: 1>}, {transform_indices = @transform_2, window_bounds = array<i64: 1, 4, 256>}, {transform_indices = @transform_3, window_bounds = array<i64: 1, 4, 256>}]} {
    %c0 = arith.constant 0 : index
    %c0_0 = arith.constant 0 : index
    %c0_1 = arith.constant 0 : index
    %0 = vector.load %arg3[%c0, %c0_0, %c0_1] : memref<1x4x256xf32, #tpu.memory_space<vmem>>, vector<1x4x256xf32>
    %1 = vector.shape_cast %0 : vector<1x4x256xf32> to vector<4x256xf32>
    %2 = tpu.iota {dimensions = array<i32: 1>} : vector<1x256xi32>
    %c16_i32 = arith.constant 16 : i32
    %c0_i32 = arith.constant 0 : i32
    %3 = arith.cmpi eq, %c16_i32, %c0_i32 : i32
    %c1_i32 = arith.constant 1 : i32
    %4 = arith.select %3, %c1_i32, %c16_i32 : i32
    %5 = vector.broadcast %4 : i32 to vector<1x256xi32>
    %6 = arith.remsi %2, %5 : vector<1x256xi32>
    %c0_i32_2 = arith.constant 0 : i32
    %7 = vector.broadcast %c0_i32_2 : i32 to vector<1x256xi32>
    %8 = arith.cmpi ne, %6, %7 : vector<1x256xi32>
    %c0_i32_3 = arith.constant 0 : i32
    %9 = vector.broadcast %c0_i32_3 : i32 to vector<1x256xi32>
    %10 = arith.cmpi slt, %6, %9 : vector<1x256xi32>
    %c0_i32_4 = arith.constant 0 : i32
    %11 = arith.cmpi slt, %4, %c0_i32_4 : i32
    %12 = vector.broadcast %11 : i1 to vector<1x256xi1>
    %13 = vector.broadcast %12 : vector<1x256xi1> to vector<1x256xi1>
    %14 = arith.xori %10, %13 : vector<1x256xi1>
    %15 = arith.andi %14, %8 : vector<1x256xi1>
    %16 = vector.broadcast %4 : i32 to vector<1x256xi32>
    %17 = arith.addi %6, %16 : vector<1x256xi32>
    %18 = arith.select %15, %17, %6 : vector<1x256xi1>, vector<1x256xi32>
    %cst = arith.constant 0.000000e+00 : f32
    %19 = vector.broadcast %cst : f32 to vector<4x256xf32>
    %c0_5 = arith.constant 0 : index
    %c0_6 = arith.constant 0 : index
    %20 = vector.load %arg1[%c0_5, %c0_6] : memref<4x9xf32, #tpu.memory_space<vmem>>, vector<4x1xf32>
    %c17_i32 = arith.constant 17 : i32
    %21 = tpu.dynamic_rotate %1 by %c17_i32 dim 1 : vector<4x256xf32>, i32 -> vector<4x256xf32>
    %c16_i32_7 = arith.constant 16 : i32
    %22 = vector.broadcast %c16_i32_7 : i32 to vector<1x256xi32>
    %23 = arith.cmpi sge, %2, %22 : vector<1x256xi32>
    %c1_i32_8 = arith.constant 1 : i32
    %24 = vector.broadcast %c1_i32_8 : i32 to vector<1x256xi32>
    %25 = arith.cmpi sge, %18, %24 : vector<1x256xi32>
    %26 = arith.andi %23, %25 : vector<1x256xi1>
    %cst_9 = arith.constant 0.000000e+00 : f32
    %27 = vector.shape_cast %26 : vector<1x256xi1> to vector<1x256xi1>
    %28 = vector.broadcast %27 : vector<1x256xi1> to vector<4x256xi1>
    %29 = vector.broadcast %cst_9 : f32 to vector<4x256xf32>
    %30 = arith.select %28, %21, %29 : vector<4x256xi1>, vector<4x256xf32>
    %31 = vector.broadcast %20 : vector<4x1xf32> to vector<4x256xf32>
    %32 = arith.mulf %30, %31 : vector<4x256xf32>
    %33 = arith.addf %19, %32 : vector<4x256xf32>
    %c0_10 = arith.constant 0 : index
    %c1 = arith.constant 1 : index
    %34 = vector.load %arg1[%c0_10, %c1] : memref<4x9xf32, #tpu.memory_space<vmem>>, vector<4x1xf32>
    %c16_i32_11 = arith.constant 16 : i32
    %35 = tpu.dynamic_rotate %1 by %c16_i32_11 dim 1 : vector<4x256xf32>, i32 -> vector<4x256xf32>
    %c16_i32_12 = arith.constant 16 : i32
    %36 = vector.broadcast %c16_i32_12 : i32 to vector<1x256xi32>
    %37 = arith.cmpi sge, %2, %36 : vector<1x256xi32>
    %cst_13 = arith.constant 0.000000e+00 : f32
    %38 = vector.shape_cast %37 : vector<1x256xi1> to vector<1x256xi1>
    %39 = vector.broadcast %38 : vector<1x256xi1> to vector<4x256xi1>
    %40 = vector.broadcast %cst_13 : f32 to vector<4x256xf32>
    %41 = arith.select %39, %35, %40 : vector<4x256xi1>, vector<4x256xf32>
    %42 = vector.broadcast %34 : vector<4x1xf32> to vector<4x256xf32>
    %43 = arith.mulf %41, %42 : vector<4x256xf32>
    %44 = arith.addf %33, %43 : vector<4x256xf32>
    %c0_14 = arith.constant 0 : index
    %c2 = arith.constant 2 : index
    %45 = vector.load %arg1[%c0_14, %c2] : memref<4x9xf32, #tpu.memory_space<vmem>>, vector<4x1xf32>
    %c15_i32 = arith.constant 15 : i32
    %46 = tpu.dynamic_rotate %1 by %c15_i32 dim 1 : vector<4x256xf32>, i32 -> vector<4x256xf32>
    %c16_i32_15 = arith.constant 16 : i32
    %47 = vector.broadcast %c16_i32_15 : i32 to vector<1x256xi32>
    %48 = arith.cmpi sge, %2, %47 : vector<1x256xi32>
    %c14_i32 = arith.constant 14 : i32
    %49 = vector.broadcast %c14_i32 : i32 to vector<1x256xi32>
    %50 = arith.cmpi sle, %18, %49 : vector<1x256xi32>
    %51 = arith.andi %48, %50 : vector<1x256xi1>
    %cst_16 = arith.constant 0.000000e+00 : f32
    %52 = vector.shape_cast %51 : vector<1x256xi1> to vector<1x256xi1>
    %53 = vector.broadcast %52 : vector<1x256xi1> to vector<4x256xi1>
    %54 = vector.broadcast %cst_16 : f32 to vector<4x256xf32>
    %55 = arith.select %53, %46, %54 : vector<4x256xi1>, vector<4x256xf32>
    %56 = vector.broadcast %45 : vector<4x1xf32> to vector<4x256xf32>
    %57 = arith.mulf %55, %56 : vector<4x256xf32>
    %58 = arith.addf %44, %57 : vector<4x256xf32>
    %c0_17 = arith.constant 0 : index
    %c3 = arith.constant 3 : index
    %59 = vector.load %arg1[%c0_17, %c3] : memref<4x9xf32, #tpu.memory_space<vmem>>, vector<4x1xf32>
    %c1_i32_18 = arith.constant 1 : i32
    %60 = tpu.dynamic_rotate %1 by %c1_i32_18 dim 1 : vector<4x256xf32>, i32 -> vector<4x256xf32>
    %c1_i32_19 = arith.constant 1 : i32
    %61 = vector.broadcast %c1_i32_19 : i32 to vector<1x256xi32>
    %62 = arith.cmpi sge, %18, %61 : vector<1x256xi32>
    %cst_20 = arith.constant 0.000000e+00 : f32
    %63 = vector.shape_cast %62 : vector<1x256xi1> to vector<1x256xi1>
    %64 = vector.broadcast %63 : vector<1x256xi1> to vector<4x256xi1>
    %65 = vector.broadcast %cst_20 : f32 to vector<4x256xf32>
    %66 = arith.select %64, %60, %65 : vector<4x256xi1>, vector<4x256xf32>
    %67 = vector.broadcast %59 : vector<4x1xf32> to vector<4x256xf32>
    %68 = arith.mulf %66, %67 : vector<4x256xf32>
    %69 = arith.addf %58, %68 : vector<4x256xf32>
    %c0_21 = arith.constant 0 : index
    %c4 = arith.constant 4 : index
    %70 = vector.load %arg1[%c0_21, %c4] : memref<4x9xf32, #tpu.memory_space<vmem>>, vector<4x1xf32>
    %71 = vector.broadcast %70 : vector<4x1xf32> to vector<4x256xf32>
    %72 = arith.mulf %1, %71 : vector<4x256xf32>
    %73 = arith.addf %69, %72 : vector<4x256xf32>
    %c0_22 = arith.constant 0 : index
    %c5 = arith.constant 5 : index
    %74 = vector.load %arg1[%c0_22, %c5] : memref<4x9xf32, #tpu.memory_space<vmem>>, vector<4x1xf32>
    %c255_i32 = arith.constant 255 : i32
    %75 = tpu.dynamic_rotate %1 by %c255_i32 dim 1 : vector<4x256xf32>, i32 -> vector<4x256xf32>
    %c14_i32_23 = arith.constant 14 : i32
    %76 = vector.broadcast %c14_i32_23 : i32 to vector<1x256xi32>
    %77 = arith.cmpi sle, %18, %76 : vector<1x256xi32>
    %cst_24 = arith.constant 0.000000e+00 : f32
    %78 = vector.shape_cast %77 : vector<1x256xi1> to vector<1x256xi1>
    %79 = vector.broadcast %78 : vector<1x256xi1> to vector<4x256xi1>
    %80 = vector.broadcast %cst_24 : f32 to vector<4x256xf32>
    %81 = arith.select %79, %75, %80 : vector<4x256xi1>, vector<4x256xf32>
    %82 = vector.broadcast %74 : vector<4x1xf32> to vector<4x256xf32>
    %83 = arith.mulf %81, %82 : vector<4x256xf32>
    %84 = arith.addf %73, %83 : vector<4x256xf32>
    %c0_25 = arith.constant 0 : index
    %c6 = arith.constant 6 : index
    %85 = vector.load %arg1[%c0_25, %c6] : memref<4x9xf32, #tpu.memory_space<vmem>>, vector<4x1xf32>
    %c241_i32 = arith.constant 241 : i32
    %86 = tpu.dynamic_rotate %1 by %c241_i32 dim 1 : vector<4x256xf32>, i32 -> vector<4x256xf32>
    %c240_i32 = arith.constant 240 : i32
    %87 = vector.broadcast %c240_i32 : i32 to vector<1x256xi32>
    %88 = arith.cmpi slt, %2, %87 : vector<1x256xi32>
    %c1_i32_26 = arith.constant 1 : i32
    %89 = vector.broadcast %c1_i32_26 : i32 to vector<1x256xi32>
    %90 = arith.cmpi sge, %18, %89 : vector<1x256xi32>
    %91 = arith.andi %88, %90 : vector<1x256xi1>
    %cst_27 = arith.constant 0.000000e+00 : f32
    %92 = vector.shape_cast %91 : vector<1x256xi1> to vector<1x256xi1>
    %93 = vector.broadcast %92 : vector<1x256xi1> to vector<4x256xi1>
    %94 = vector.broadcast %cst_27 : f32 to vector<4x256xf32>
    %95 = arith.select %93, %86, %94 : vector<4x256xi1>, vector<4x256xf32>
    %96 = vector.broadcast %85 : vector<4x1xf32> to vector<4x256xf32>
    %97 = arith.mulf %95, %96 : vector<4x256xf32>
    %98 = arith.addf %84, %97 : vector<4x256xf32>
    %c0_28 = arith.constant 0 : index
    %c7 = arith.constant 7 : index
    %99 = vector.load %arg1[%c0_28, %c7] : memref<4x9xf32, #tpu.memory_space<vmem>>, vector<4x1xf32>
    %c240_i32_29 = arith.constant 240 : i32
    %100 = tpu.dynamic_rotate %1 by %c240_i32_29 dim 1 : vector<4x256xf32>, i32 -> vector<4x256xf32>
    %c240_i32_30 = arith.constant 240 : i32
    %101 = vector.broadcast %c240_i32_30 : i32 to vector<1x256xi32>
    %102 = arith.cmpi slt, %2, %101 : vector<1x256xi32>
    %cst_31 = arith.constant 0.000000e+00 : f32
    %103 = vector.shape_cast %102 : vector<1x256xi1> to vector<1x256xi1>
    %104 = vector.broadcast %103 : vector<1x256xi1> to vector<4x256xi1>
    %105 = vector.broadcast %cst_31 : f32 to vector<4x256xf32>
    %106 = arith.select %104, %100, %105 : vector<4x256xi1>, vector<4x256xf32>
    %107 = vector.broadcast %99 : vector<4x1xf32> to vector<4x256xf32>
    %108 = arith.mulf %106, %107 : vector<4x256xf32>
    %109 = arith.addf %98, %108 : vector<4x256xf32>
    %c0_32 = arith.constant 0 : index
    %c8 = arith.constant 8 : index
    %110 = vector.load %arg1[%c0_32, %c8] : memref<4x9xf32, #tpu.memory_space<vmem>>, vector<4x1xf32>
    %c239_i32 = arith.constant 239 : i32
    %111 = tpu.dynamic_rotate %1 by %c239_i32 dim 1 : vector<4x256xf32>, i32 -> vector<4x256xf32>
    %c240_i32_33 = arith.constant 240 : i32
    %112 = vector.broadcast %c240_i32_33 : i32 to vector<1x256xi32>
    %113 = arith.cmpi slt, %2, %112 : vector<1x256xi32>
    %c14_i32_34 = arith.constant 14 : i32
    %114 = vector.broadcast %c14_i32_34 : i32 to vector<1x256xi32>
    %115 = arith.cmpi sle, %18, %114 : vector<1x256xi32>
    %116 = arith.andi %113, %115 : vector<1x256xi1>
    %cst_35 = arith.constant 0.000000e+00 : f32
    %117 = vector.shape_cast %116 : vector<1x256xi1> to vector<1x256xi1>
    %118 = vector.broadcast %117 : vector<1x256xi1> to vector<4x256xi1>
    %119 = vector.broadcast %cst_35 : f32 to vector<4x256xf32>
    %120 = arith.select %118, %111, %119 : vector<4x256xi1>, vector<4x256xf32>
    %121 = vector.broadcast %110 : vector<4x1xf32> to vector<4x256xf32>
    %122 = arith.mulf %120, %121 : vector<4x256xf32>
    %123 = arith.addf %109, %122 : vector<4x256xf32>
    %cst_36 = arith.constant dense<0.000000e+00> : vector<256xf32>
    %124 = vector.multi_reduction <add>, %123, %cst_36 [0] : vector<4x256xf32> to vector<256xf32>
    %125 = vector.shape_cast %124 : vector<256xf32> to vector<1x256xf32>
    %c0_37 = arith.constant 0 : index
    %126 = memref.load %arg2[%c0_37] : memref<1xf32, #tpu.memory_space<smem>>
    %127 = vector.broadcast %126 : f32 to vector<1x256xf32>
    %128 = arith.addf %125, %127 : vector<1x256xf32>
    %129 = arith.negf %128 : vector<1x256xf32>
    %130 = math.exp %129 : vector<1x256xf32>
    %cst_38 = arith.constant 1.000000e+00 : f32
    %131 = vector.broadcast %cst_38 : f32 to vector<1x256xf32>
    %132 = arith.addf %131, %130 : vector<1x256xf32>
    %133 = arith.divf %131, %132 : vector<1x256xf32>
    %134 = vector.broadcast %133 : vector<1x256xf32> to vector<4x256xf32>
    %135 = arith.mulf %1, %134 : vector<4x256xf32>
    %c0_39 = arith.constant 0 : index
    %c0_40 = arith.constant 0 : index
    %c0_41 = arith.constant 0 : index
    %136 = vector.load %arg4[%c0_39, %c0_40, %c0_41] : memref<1x4x256xf32, #tpu.memory_space<vmem>>, vector<1x4x256xf32>
    %137 = vector.shape_cast %136 : vector<1x4x256xf32> to vector<4x256xf32>
    %138 = vector.shape_cast %135 : vector<4x256xf32> to vector<1x4x256xf32>
    tpu.vector_store %arg4[%c0_39, %c0_40, %c0_41], %138 {strides = array<i32>} : memref<1x4x256xf32, #tpu.memory_space<vmem>>, vector<1x4x256xf32>,
    return
  }
  func.func @transform_0(%arg0: i32) -> (i32, i32) {
    %c0_i32 = arith.constant 0 : i32
    %c0_i32_0 = arith.constant 0 : i32
    %c0_i32_1 = arith.constant 0 : i32
    return %c0_i32, %c0_i32_0 : i32, i32
  }
  func.func @transform_1(%arg0: i32) -> i32 {
    %c0_i32 = arith.constant 0 : i32
    %c0_i32_0 = arith.constant 0 : i32
    return %c0_i32 : i32
  }
  func.func @transform_2(%arg0: i32) -> (i32, i32, i32) {
    %c0_i32 = arith.constant 0 : i32
    %c0_i32_0 = arith.constant 0 : i32
    %c0_i32_1 = arith.constant 0 : i32
    return %arg0, %c0_i32, %c0_i32_0 : i32, i32, i32
  }
  func.func @transform_3(%arg0: i32) -> (i32, i32, i32) {
    %c0_i32 = arith.constant 0 : i32
    %c0_i32_0 = arith.constant 0 : i32
    %c0_i32_1 = arith.constant 0 : i32
    return %arg0, %c0_i32, %c0_i32_0 : i32, i32, i32
  }
}

</mosaic_0001>

<bundles_post_ra>
// kernel: tpu_custom_call.1
= control target key start
LH: loop header
LB: loop body
LE: loop exit
PB: predicated region body
PF: predicated region fallthrough
CT: control target
= control target key end

     0   :  { %s1203_s0 = inlined_call_operand.hbm [shape: f32[4,9], index: 0, kind: input, shape index: {}]   ;;  %s1204_s1 = inlined_call_operand.<no memory space> [shape: f32[1], index: 1, kind: input, shape index: {}]   ;;  %s1205_s2 = inlined_call_operand.hbm [shape: f32[2,4,256], index: 2, kind: input, shape index: {}]   ;;  %s1206_s3 = inlined_call_operand.hbm [shape: f32[2,4,256], index: 3, kind: output, shape index: {}]  }
   0x1   :  { %8 = sst [smem:[#allocation2]] %s1204_s1 }
   0x2   :  { %9 = vsyncpa [#allocation4], 0 }
   0x3   :  { %10 = vsyncpa [#allocation7], 0 }
   0x4   :  { %12 = vsyncpa [#allocation7 + $0x1], 0 }
   0x5   :  { %13 = vsyncpa [#allocation5], 0 }
   0x6   :  { %15 = vsyncpa [#allocation5 + $0x1], 0  ;;  %s943_s14 = smov 0   ;;  %s945_s15 = smov 0  }
   0x7   :  { %s947_s16 = smov 0   ;;  %s949_s17 = smov 0  }
   0x8 LB: > { %s964_s1 = sadd.s32 4294967295, %s899_s17   ;;  %s656_s18 = sadd.s32 4294967294, %s899_s17   ;;  %s899_s17 = sphi %s949_s17, %s1232_s17   ;;  %s895_s16 = sphi %s947_s16, %s1231_s16   ;;  %s891_s15 = sphi %s945_s15, %s1230_s15   ;;  %s887_s14 = sphi %s943_s14, %s1229_s14  }
   0x9   : > { %p83_p0 = scmp.ne.s32.totalorder %s891_s15, %s887_s14  ;;  %p84_p1 = scmp.eq.s32.totalorder %s964_s1, 0 }
   0xa   : > { %p107_p2 = scmp.eq.s32.totalorder %s964_s1, 1  ;;  %p113_p3 = scmp.eq.s32.totalorder %s656_s18, 1 }
   0xb   : > { %p973_p4 = por %p84_p1, %p83_p0  ;;  %p657_p5 = scmp.ge.s32.totalorder %s899_s17, 1 }
   0xc   : > { %p978_p6 = por %p113_p3, %p83_p0  ;;  %p120_p7 = scmp.lt.s32.totalorder %s899_s17, 3 }
   0xd   : > { %s132_s23 = sshll.u32 %s1203_s0, 4  ;;  %s901_s25 = smov [#allocation3]   ;;  %s133_s23 = int_to_ptr.hbm [resolvable:$true] %s132_s23 }
   0xe   : > { %p986_p8 = pnand %p657_p5, %p120_p7  ;;  %s134_s26 = sshll.u32 %s901_s25, 4  ;;  %s135_s26 = int_to_ptr.vmem [resolvable:$true] %s134_s26 }
   0xf   : > { %s996_s27 = sadd.s32 1, %s899_s17   ;;  %s70_s28 = sadd.s32 1, %s895_s16 }
  0x10   : > { %p684_p10 = pneg %p986_p8  ;;  %s67_s29 = ssub.s32 %s899_s17, %s996_s27 }
  0x11   : > { %p68_p12 = scmp.eq.s32.totalorder %s67_s29, 0  ;;  %p77_p13 = scmp.ne.s32.totalorder %s895_s16, %s891_s15 }
  0x12   : > { %p685_p11 = pnand %p684_p10, %p84_p1  ;;  %p78_p0 = scmp.eq.s32.totalorder %s899_s17, 0 }
  0x13   : > { %s1005_s30 = scalar_select %p68_p12, %s895_s16, %s70_s28  }
  0x14   : > { %687 = dma.hbm_to_vmem [thread:$0]  (!%p685_p11), %s133_s23, 64, %s135_s26, [#allocation4]  }
  0x15   : > { %p1009_p3 = por %p107_p2, %p77_p13  ;;  %p697_p5 = scmp.lt.s32.totalorder %s899_s17, 2 }
  0x16   : > { %s148_s5 = sand.u32 1, %s895_s16   ;;  %s674_s6 = sshll.u32 %s899_s17, 3 }
  0x17   : > { %p79_p7 = por %p78_p0, %p77_p13  ;;  %s660_s7 = sshll.u32 %s148_s5, 3 }
  0x18   : > { %s157_s10 = scalar_lea.hbm %s1205_s2, %s674_s6  ;;  %s152_s12 = scalar_lea.vmem [#allocation6], %s660_s7 }
  0x19   : > { %s159_s11 = sshll.u32 %s157_s10, 4  ;;  %s161_s13 = sshll.u32 %s152_s12, 4  ;;  %s160_s11 = int_to_ptr.hbm [resolvable:$true] %s159_s11  ;;  %s162_s13 = int_to_ptr.vmem [resolvable:$true] %s161_s13 }
  0x1a   : > { %p1019_p10 = pnand %p697_p5, %p79_p7  ;;  %s149_s21 = scalar_lea.sflag [#allocation7], %s148_s5 }
  0x1b   : > { %s799_s22 = sshra.s32 %s160_s11, 4  ;;  %s806_s28 = scalar_lea.hbm %s1205_s2, 16  ;;  %s800_s22 = int_to_ptr.hbm [resolvable:$true] %s799_s22 }
  0x1c   : > { %s801_s23 = scalar_lea.hbm %s800_s22, 8  ;;  %p803_p11 = pneg %p1019_p10 }
  0x1d   : > { %p802_p2 = scmp.ne.s32.totalorder %s800_s22, %s801_s23  ;;  %p807_p0 = scmp.lt.s32.totalorder %s800_s22, %s1205_s2 }
  0x1e   : > { %p808_p5 = scmp.lt.s32.totalorder %s806_s28, %s801_s23 }
  0x1f   : > { %p804_p12 = pnand %p803_p11, %p802_p2 }
  0x20   : > { %p809_p7 = por %p808_p5, %p807_p0 }
  0x21   : > { %p805_p13 = pneg %p804_p12 }
  0x23   : > { %p810_p9 = pnand %p809_p7, %p805_p13 }
  0x25   : > { %813 = shalt.err (!%p810_p9)
}
  0x26   : > { %691 = dma.hbm_to_vmem [thread:$0]  (!%p1019_p10), %s160_s11, 128, %s162_s13, %s149_s21  }
  0x27   : > { %170 = sbr.rel (%p986_p8) target bundleno = 383 (0x17f), region = 32 }
  0x2c   : > { %874 = dma.done.wait (%p84_p1), [#allocation4], 64  }
  0x2d   : > { %876 = vsyncadd (%p84_p1), [#allocation4], 4294967232  ;;  %s1040_s5 = sand.u32 1, %s891_s15  }
  0x2e   : > { %s665_s7 = sshll.u32 %s1040_s5, 3  ;;  %s178_s8 = scalar_lea.sflag [#allocation7], %s1040_s5 }
  0x2f   : > { %s181_s9 = scalar_lea.vmem [#allocation6], %s665_s7 }
  0x30   : > { %878 = dma.done.wait (%p973_p4), %s178_s8, 128  }
  0x31   : > { %880 = vsyncadd (%p973_p4), %s178_s8, 4294967168  ;;  %v902_v0 = vmov 4   ;;  %v903_v1 = vmov 2   ;;  %v356_v2 = vld [vmem:[#allocation3] sm:$0xf]  ;;  %v1050_v4 = vld [vmem:[%s181_s9] sm:$0xff]  ;;  %v206_v51 = vlaneseq }
  0x32   : > { %751 = vset.pattern.permute.xlu0 %v902_v0  ;;  %754 = vset.pattern.permute.xlu1 %v903_v1  ;;  %v296_v3 = vld [vmem:[#allocation3] sm:$0xf]  ;;  %235 = vst [vmem:[#allocation1] ss:$2 sm:$0xff] %v1050_v4  ;;  %v904_v6 = vmov 0   ;;  %v905_v8 = vmov 3  }
  0x33   : > { %359 = vperm.xlu0 %751, %v356_v2   ;;  %321 = vperm.xlu1 %754, %v296_v3   ;;  %v233_v5 = vld [vmem:[#allocation3] sm:$0xf]  ;;  %v906_v11 = vmov 1   ;;  %s907_s19 = smov 17   ;;  %s908_s24 = smov 16   ;;  %v911_v19 = vmov 5  }
  0x34   : > { %752 = vset.pattern.permute.xlu2 %v904_v6  ;;  %v328_v7 = vld [vmem:[#allocation3] sm:$0xf]  ;;  %s909_s10 = smov 15   ;;  %s910_s11 = smov 1   ;;  %v912_v21 = vmov 839922192  }
  0x35   : > { %261 = vperm.xlu2 %752, %v233_v5   ;;  %v268_v12 = vld [vmem:[#allocation3] sm:$0xf]  ;;  %v362_v22 = vunpack.c.l.s4 %v912_v21  ;;  %v913_v23 = vmov 6   ;;  %v914_v29 = vmov 7   ;;  %v915_v34 = vmov 8   ;;  %s916_s12 = smov 127  }
  0x36   : > { %v375_v20 = vld [vmem:[#allocation3] sm:$0xf]  ;;  %s917_s13 = smov 113   ;;  %s918_s18 = smov 112   ;;  %v1065_v54 = vand.u32 127, %v206_v51 }
  0x37   : > { %v403_v24 = vld [vmem:[#allocation3] sm:$0xf]  ;;  %v363_v25 = vunpack.c.0.s8 %v362_v22  ;;  %s919_s21 = smov 111   ;;  %s508_s22 = sld [smem:[#allocation2]] }
  0x38   : > { %v435_v30 = vld [vmem:[#allocation3] sm:$0xf]  ;;  %v1068_v56 = vadd.s32 128, %v1065_v54  ;;  %v213_v57 = vand.u32 15, %v1065_v54  ;;  %vm244_vm0 = vcmp.lt.s32.totalorder %v1065_v54, 17  ;;  %vm247_vm1 = vcmp.ge.s32.totalorder %v1065_v54, 16 }
  0x39   : > { %v237_v9 = vld.sshfl [vmem:[#allocation1 + $0x8] sm:$0xff pattern:$0x75316420]  ;;  %v236_v10 = vld.sshfl [vmem:[#allocation1] sm:$0xff pattern:$0x75316420] }
  0x3a   : > { %269 = vst [vmem:[#allocation1] ss:$2 sm:$0xff] %v1050_v4  ;;  %v463_v33 = vld [vmem:[#allocation3] sm:$0xf]  ;;  %v220_v60 = vand.u32 15, %v1068_v56  ;;  %vm1076_vm2 = vcmp.ge.s32.totalorder %v213_v57, 1 }
  0x3b   : > { %755 = vset.pattern.permute.xlu1 %v905_v8  ;;  %753 = vset.pattern.permute.xlu0 %v906_v11  ;;  %vm278_vm3 = vcmp.lt.s32.totalorder %v1065_v54, 16  ;;  %vm1089_vm5 = vmand %vm247_vm1, %vm1076_vm2  ;;  %vm306_vm6 = vcmp.lt.s32.totalorder %v1065_v54, 15  ;;  %vm1094_vm7 = vcmp.le.s32.totalorder %v213_v57, 14  ;;  %vm338_vm10 = vcmp.lt.s32.totalorder %v1065_v54, 1  ;;  %s675_s23 = sshll.u32 %s964_s1, 3  ;;  %s204_s1 = scalar_lea.vmem [#allocation8], %s665_s7 }
  0x3c   : > { %349 = vperm.xlu1 %755, %v328_v7   ;;  %240 = vrot.lane.b32.xlu0 %v236_v10, %s907_s19  ;;  %vm1081_vm4 = vcmp.ge.s32.totalorder %v220_v60, 1  ;;  %vm1104_vm8 = vcmp.le.s32.totalorder %v220_v60, 14  ;;  %vm1112_vm9 = vmand %vm247_vm1, %vm1094_vm7  ;;  %vm385_vm11 = vcmp.lt.s32.totalorder %v1065_v54, 127  ;;  %vm413_vm12 = vcmp.lt.s32.totalorder %v1065_v54, 113  ;;  %s569_s28 = scalar_lea.hbm %s1206_s3, %s675_s23  ;;  %s571_s29 = sshll.u32 %s204_s1, 4  ;;  %s572_s29 = int_to_ptr.vmem [resolvable:$true] %s571_s29 }
  0x3d   : > { %vm417_vm13 = vcmp.lt.s32.totalorder %v1068_v56, 240  ;;  %vm445_vm14 = vcmp.lt.s32.totalorder %v1065_v54, 112  ;;  %s573_s6 = sshll.u32 %s569_s28, 4  ;;  %s558_s8 = scalar_lea.sflag [#allocation5], %s1040_s5  ;;  %s574_s6 = int_to_ptr.hbm [resolvable:$true] %s573_s6 }
  0x3e   : > { %vm1133_vm15 = vmand %vm417_vm13, %vm1081_vm4  ;;  %s843_s9 = sshra.s32 %s574_s6, 4  ;;  %s844_s9 = int_to_ptr.hbm [resolvable:$true] %s843_s9 }
  0x3f   : > { %p850_p9 = scmp.lt.s32.totalorder %s844_s9, %s1206_s3 }
  0x41   : > { %v270_v13 = vld.sshfl [vmem:[#allocation1] sm:$0xff pattern:$0x75316420]  ;;  %v271_v14 = vld.sshfl [vmem:[#allocation1 + $0x8] sm:$0xff pattern:$0x75316420] }
  0x42   : > { %297 = vst [vmem:[#allocation1] ss:$2 sm:$0xff] %v1050_v4  ;;  %276 = vrot.lane.b32.xlu2 %v271_v14, %s908_s24 }
  0x44   : > { %242 = vrot.lane.b32.xlu1 %v237_v9, %s907_s19  ;;  %289 = vperm.xlu0 %753, %v268_v12   ;;  %s845_s19 = scalar_lea.hbm %s844_s9, 8 }
  0x45   : > { %756 = vset.pattern.permute.xlu1 %v911_v19  ;;  %p846_p1 = scmp.ne.s32.totalorder %s844_s9, %s845_s19 }
  0x47   : > { %p847_p4 = pnand %p846_p1, %p1009_p3 }
  0x49   : > { %v298_v15 = vld.sshfl [vmem:[#allocation1] sm:$0xff pattern:$0x75316420]  ;;  %v299_v16 = vld.sshfl [vmem:[#allocation1 + $0x8] sm:$0xff pattern:$0x75316420]  ;;  %p848_p8 = pneg %p847_p4 }
  0x4a   : > { %329 = vst [vmem:[#allocation1] ss:$2 sm:$0xff] %v1050_v4  ;;  %304 = vrot.lane.b32.xlu2 %v299_v16, %s909_s10 }
  0x4c   : > { %274 = vrot.lane.b32.xlu1 %v270_v13, %s908_s24  ;;  %760 = vset.pattern.permute.xlu0 %v915_v34 }
  0x51   : > { %v331_v17 = vld.sshfl [vmem:[#allocation1 + $0x8] sm:$0xff pattern:$0x75316420]  ;;  %v330_v18 = vld.sshfl [vmem:[#allocation1] sm:$0xff pattern:$0x75316420] }
  0x52   : > { %336 = vrot.lane.b32.xlu0 %v331_v17, %s910_s11  ;;  %334 = vrot.lane.b32.xlu2 %v330_v18, %s910_s11 }
  0x54   : > { %302 = vrot.lane.b32.xlu1 %v298_v15, %s909_s10  ;;  %s849_s10 = scalar_lea.hbm %s1206_s3, 16 }
  0x55   : > { %p851_p10 = scmp.lt.s32.totalorder %s849_s10, %s845_s19 }
  0x57   : > { %p852_p2 = por %p851_p10, %p850_p9 }
  0x59   : > { %p853_p11 = pnand %p852_p2, %p848_p8 }
  0x5c   : > { %396 = vperm.xlu1 %756, %v375_v20  }
  0x64   : > { %757 = vset.pattern.permute.xlu1 %v913_v23 }
  0x65   : > { %428 = vperm.xlu1 %757, %v403_v24  }
  0x6d   : > { %758 = vset.pattern.permute.xlu1 %v914_v29 }
  0x6e   : > { %456 = vperm.xlu1 %758, %v435_v30  }
  0x76   : > { %759 = vset.pattern.permute.xlu1 %v915_v34 }
  0x77   : > { %486 = vperm.xlu1 %759, %v463_v33  }
  0x8f   : > { %v262_v44 = vpop.permute.xlu2 %261 }
  0x9c   : > { %v277_v46 = vpop.permute.xlu2 %276 }
  0xa4   : > { %v305_v49 = vpop.permute.xlu2 %304 }
  0xa5   : > { %v360_v26 = vpop.permute.xlu0 %359  ;;  %v322_v43 = vpop.permute.xlu1 %321 }
  0xa6   : > { %v364_v27 = vperm.slane %v360_v26, %v363_v25 }
  0xa8   : > { %v366_v28 = vmul.f32 %v364_v27, %v1050_v4 }
  0xaa   : > { %368 = vst [vmem:[#allocation1] ss:$2 sm:$0xff] %v366_v28 }
  0xac   : > { %v335_v53 = vpop.permute.xlu2 %334 }
  0xae   : > { %v350_v45 = vpop.permute.xlu1 %349  ;;  %v241_v48 = vpop.permute.xlu0 %240 }
  0xb1   : > { %v1057_v31 = vld.sshfl [vmem:[#allocation1] sm:$0xff pattern:$0x75316420]  ;;  %v1059_v32 = vld.sshfl [vmem:[#allocation1 + $0x8] sm:$0xff pattern:$0x75316420] }
  0xb2   : > { %376 = vst [vmem:[#allocation1] ss:$2 sm:$0xff] %v1050_v4 }
  0xb6   : > { %v243_v47 = vpop.permute.xlu1 %242  ;;  %v290_v52 = vpop.permute.xlu0 %289 }
  0xb7   : > { %v245_v1 = vsel %vm244_vm0, %v241_v48, %v243_v47  ;;  %v246_v2 = vsel %vm244_vm0, %v243_v47, %v241_v48  ;;  %vm473_vm0 = vcmp.lt.s32.totalorder %v1065_v54, 111 }
  0xb8   : > { %v257_v7 = vsel %vm1089_vm5, %v246_v2, 0.0  ;;  %v258_v8 = vsel %vm1081_vm4, %v245_v1, 0.0 }
  0xb9   : > { %v378_v35 = vld.sshfl [vmem:[#allocation1 + $0x8] sm:$0xff pattern:$0x75316420]  ;;  %v377_v36 = vld.sshfl [vmem:[#allocation1] sm:$0xff pattern:$0x75316420]  ;;  %v264_v16 = vmul.f32 %v262_v44, %v257_v7  ;;  %v265_v17 = vmul.f32 %v262_v44, %v258_v8 }
  0xba   : > { %383 = vrot.lane.b32.xlu0 %v378_v35, %s916_s12  ;;  %404 = vst [vmem:[#allocation1] ss:$2 sm:$0xff] %v1050_v4  ;;  %381 = vrot.lane.b32.xlu2 %v377_v36, %s916_s12 }
  0xbe   : > { %v275_v50 = vpop.permute.xlu1 %274 }
  0xbf   : > { %v280_v3 = vsel %vm278_vm3, %v277_v46, %v275_v50  ;;  %v279_v9 = vsel %vm278_vm3, %v275_v50, %v277_v46 }
  0xc0   : > { %v285_v10 = vsel %vm247_vm1, %v280_v3, 0.0  ;;  %v293_v19 = vmul.f32 %v290_v52, %v279_v9  ;;  %vm477_vm1 = vmand %vm417_vm13, %vm1104_vm8 }
  0xc1   : > { %v406_v37 = vld.sshfl [vmem:[#allocation1 + $0x8] sm:$0xff pattern:$0x75316420]  ;;  %v405_v38 = vld.sshfl [vmem:[#allocation1] sm:$0xff pattern:$0x75316420]  ;;  %v292_v18 = vmul.f32 %v290_v52, %v285_v10 }
  0xc2   : > { %411 = vrot.lane.b32.xlu0 %v406_v37, %s917_s13  ;;  %436 = vst [vmem:[#allocation1] ss:$2 sm:$0xff] %v1050_v4  ;;  %409 = vrot.lane.b32.xlu2 %v405_v38, %s917_s13  ;;  %v295_v26 = vadd.f32 %v293_v19, %v265_v17 }
  0xc3   : > { %v294_v25 = vadd.f32 %v292_v18, %v264_v16 }
  0xc4   : > { %v337_v58 = vpop.permute.xlu0 %336 }
  0xc5   : > { %v339_v23 = vsel %vm338_vm10, %v335_v53, %v337_v58  ;;  %v340_v24 = vsel %vm338_vm10, %v337_v58, %v335_v53 }
  0xc6   : > { %v303_v55 = vpop.permute.xlu1 %302  ;;  %v345_v30 = vsel %vm1076_vm2, %v340_v24, 0.0  ;;  %v346_v33 = vsel %vm1081_vm4, %v339_v23, 0.0 }
  0xc7   : > { %v307_v14 = vsel %vm306_vm6, %v303_v55, %v305_v49  ;;  %v308_v15 = vsel %vm306_vm6, %v305_v49, %v303_v55  ;;  %v352_v34 = vmul.f32 %v350_v45, %v345_v30  ;;  %v353_v35 = vmul.f32 %v350_v45, %v346_v33 }
  0xc8   : > { %v317_v21 = vsel %vm1112_vm9, %v308_v15, 0.0  ;;  %v318_v22 = vsel %vm1104_vm8, %v307_v14, 0.0 }
  0xc9   : > { %v437_v39 = vld.sshfl [vmem:[#allocation1] sm:$0xff pattern:$0x75316420]  ;;  %v438_v40 = vld.sshfl [vmem:[#allocation1 + $0x8] sm:$0xff pattern:$0x75316420]  ;;  %v324_v28 = vmul.f32 %v322_v43, %v317_v21  ;;  %v325_v29 = vmul.f32 %v322_v43, %v318_v22 }
  0xca   : > { %443 = vrot.lane.b32.xlu0 %v438_v40, %s918_s18  ;;  %464 = vst [vmem:[#allocation1] ss:$2 sm:$0xff] %v1050_v4  ;;  %441 = vrot.lane.b32.xlu2 %v437_v39, %s918_s18 }
  0xcb   : > { %v326_v37 = vadd.f32 %v324_v28, %v294_v25  ;;  %v327_v38 = vadd.f32 %v325_v29, %v295_v26 }
  0xcd   : > { %v354_v48 = vadd.f32 %v352_v34, %v326_v37  ;;  %v355_v49 = vadd.f32 %v353_v35, %v327_v38 }
  0xce   : > { %v1072_v61 = vpop.permute.xlu1 %396 }
  0xcf   : > { %v373_v60 = vadd.f32 %v1057_v31, %v354_v48 }
  0xd1   : > { %v466_v41 = vld.sshfl [vmem:[#allocation1 + $0x8] sm:$0xff pattern:$0x75316420]  ;;  %v465_v42 = vld.sshfl [vmem:[#allocation1] sm:$0xff pattern:$0x75316420] }
  0xd2   : > { %471 = vrot.lane.b32.xlu0 %v466_v41, %s919_s21  ;;  %469 = vrot.lane.b32.xlu2 %v465_v42, %s919_s21 }
  0xd7   : > { %v429_v20 = vpop.permute.xlu1 %428 }
  0xe0   : > { %v457_v41 = vpop.permute.xlu1 %456 }
  0xe9   : > { %v487_v7 = vpop.permute.xlu1 %486 }
 0x114   : > { %v382_v59 = vpop.permute.xlu2 %381 }
 0x11c   : > { %v410_v11 = vpop.permute.xlu2 %409 }
 0x124   : > { %v442_v36 = vpop.permute.xlu2 %441 }
 0x12c   : > { %v384_v6 = vpop.permute.xlu0 %383  ;;  %v470_v62 = vpop.permute.xlu2 %469 }
 0x12d   : > { %v386_v39 = vsel %vm385_vm11, %v382_v59, %v384_v6  ;;  %v387_v40 = vsel %vm385_vm11, %v384_v6, %v382_v59  ;;  %v374_v59 = vadd.f32 %v1059_v32, %v355_v49 }
 0x12e   : > { %v392_v45 = vsel %vm1094_vm7, %v386_v39, 0.0  ;;  %v393_v46 = vsel %vm1104_vm8, %v387_v40, 0.0 }
 0x12f   : > { %v399_v53 = vmul.f32 %v1072_v61, %v392_v45  ;;  %v400_v55 = vmul.f32 %v1072_v61, %v393_v46 }
 0x131   : > { %v401_v1 = vadd.f32 %v399_v53, %v373_v60  ;;  %v402_v2 = vadd.f32 %v400_v55, %v374_v59 }
 0x134   : > { %v412_v27 = vpop.permute.xlu0 %411 }
 0x135   : > { %v414_v43 = vsel %vm413_vm12, %v410_v11, %v412_v27  ;;  %v415_v44 = vsel %vm413_vm12, %v412_v27, %v410_v11  ;;  %v509_v27 = vstv %s508_s22 }
 0x136   : > { %v424_v51 = vsel %vm1076_vm2, %v414_v43, 0.0  ;;  %v425_v52 = vsel %vm1133_vm15, %v415_v44, 0.0  ;;  %vm493_vm2 = vcmask 1043456  }
 0x137   : > { %v431_v63 = vmul.f32 %v429_v20, %v424_v51  ;;  %v432_v0 = vmul.f32 %v429_v20, %v425_v52 }
 0x139   : > { %v433_v8 = vadd.f32 %v431_v63, %v401_v1  ;;  %v434_v32 = vadd.f32 %v432_v0, %v402_v2 }
 0x13c   : > { %v444_v47 = vpop.permute.xlu0 %443 }
 0x13d   : > { %v447_v50 = vsel %vm445_vm14, %v444_v47, %v442_v36  ;;  %v446_v57 = vsel %vm445_vm14, %v442_v36, %v444_v47 }
 0x13e   : > { %v453_v58 = vsel %vm417_vm13, %v447_v50, 0.0  ;;  %v459_v3 = vmul.f32 %v457_v41, %v446_v57 }
 0x13f   : > { %v460_v6 = vmul.f32 %v457_v41, %v453_v58 }
 0x140   : > { %v461_v11 = vadd.f32 %v459_v3, %v433_v8 }
 0x141   : > { %v462_v13 = vadd.f32 %v460_v6, %v434_v32 }
 0x144   : > { %v472_v61 = vpop.permute.xlu0 %471 }
 0x145   : > { %v474_v9 = vsel %vm473_vm0, %v470_v62, %v472_v61  ;;  %v475_v31 = vsel %vm473_vm0, %v472_v61, %v470_v62 }
 0x146   : > { %v482_v10 = vsel %vm1094_vm7, %v474_v9, 0.0  ;;  %v483_v54 = vsel %vm477_vm1, %v475_v31, 0.0 }
 0x147   : > { %v489_v14 = vmul.f32 %v487_v7, %v482_v10  ;;  %v490_v15 = vmul.f32 %v487_v7, %v483_v54 }
 0x149   : > { %v491_v16 = vadd.f32 %v489_v14, %v461_v11  ;;  %v492_v12 = vadd.f32 %v490_v15, %v462_v13 }
 0x14b   : > { %v494_v56 = vsel %vm493_vm2, %v491_v16, 0.0  ;;  %v501_v17 = vsel %vm493_vm2, %v492_v12, 0.0 }
 0x14c   : > { %v495_v18 = vrot.slane %v494_v56, 4  ;;  %v502_v19 = vrot.slane %v501_v17, 4 }
 0x14e   : > { %v496_v20 = vadd.f32 %v495_v18, %v494_v56  ;;  %v503_v21 = vadd.f32 %v502_v19, %v501_v17 }
 0x150   : > { %v497_v22 = vrot.slane %v496_v20, 2  ;;  %v504_v5 = vrot.slane %v503_v21, 2 }
 0x152   : > { %v498_v23 = vadd.f32 %v497_v22, %v496_v20  ;;  %v505_v24 = vadd.f32 %v504_v5, %v503_v21 }
 0x154   : > { %v499_v25 = vrot.slane %v498_v23, 1  ;;  %v506_v26 = vrot.slane %v505_v24, 1 }
 0x156   : > { %v500_v28 = vadd.f32 %v499_v25, %v498_v23  ;;  %v507_v29 = vadd.f32 %v506_v26, %v505_v24 }
 0x158   : > { %v510_v30 = vadd.f32 %v509_v27, %v500_v28  ;;  %v511_v33 = vadd.f32 %v509_v27, %v507_v29 }
 0x15a   : > { %v667_v34 = vmul.f32 -1.442695, %v510_v30  ;;  %v668_v35 = vmul.f32 -1.442695, %v511_v33 }
 0x15c   : > { %761 = vpow2.f32 %v667_v34 }
 0x15d   : > { %763 = vpow2.f32 %v668_v35 }
 0x162   : > { %v762_v36 = vpop.eup %761 }
 0x163   : > { %v764_v37 = vpop.eup %763  ;;  %v518_v38 = vadd.f32 1.0, %v762_v36 }
 0x164   : > { %v519_v39 = vadd.f32 1.0, %v764_v37 }
 0x165   : > { %765 = vrcp.f32 %v518_v38  ;;  %vm525_vm5 = vweird.f32 %v518_v38  ;;  %v531_v51 = vand.u32 2147483648, %v518_v38  ;;  %v529_v53 = vand.u32 2147483647, %v518_v38 }
 0x166   : > { %767 = vrcp.f32 %v519_v39  ;;  %v546_v47 = vand.u32 2147483648, %v519_v39  ;;  %v544_v49 = vand.u32 2147483647, %v519_v39  ;;  %vm540_vm7 = vweird.f32 %v519_v39 }
 0x167   : > { %v532_v60 = vor.u32 1.1754944e-38, %v531_v51  ;;  %vm530_vm10 = vcmp.eq.f32.partialorder %v529_v53, 8.507059e+37 }
 0x168   : > { %v547_v57 = vor.u32 1.1754944e-38, %v546_v47  ;;  %vm545_vm9 = vcmp.eq.f32.partialorder %v544_v49, 8.507059e+37 }
 0x16b   : > { %v766_v40 = vpop.eup %765 }
 0x16c   : > { %v768_v41 = vpop.eup %767  ;;  %v521_v42 = vmul.f32 %v766_v40, %v518_v38  ;;  %vm526_vm3 = vweird.f32 %v766_v40 }
 0x16d   : > { %v536_v43 = vmul.f32 %v768_v41, %v519_v39  ;;  %vm541_vm4 = vweird.f32 %v768_v41  ;;  %vm1161_vm6 = vmor %vm525_vm5, %vm526_vm3 }
 0x16e   : > { %v522_v44 = vsub.f32 1.0, %v521_v42  ;;  %vm542_vm8 = vmor %vm540_vm7, %vm541_vm4 }
 0x16f   : > { %v537_v45 = vsub.f32 1.0, %v536_v43 }
 0x170   : > { %v523_v46 = vmul.f32 %v766_v40, %v522_v44 }
 0x171   : > { %v538_v48 = vmul.f32 %v768_v41, %v537_v45 }
 0x172   : > { %v524_v50 = vadd.f32 %v766_v40, %v523_v46 }
 0x173   : > { %v539_v55 = vadd.f32 %v768_v41, %v538_v48 }
 0x174   : > { %v528_v58 = vsel %vm1161_vm6, %v766_v40, %v524_v50 }
 0x175   : > { %v543_v59 = vsel %vm542_vm8, %v768_v41, %v539_v55  ;;  %v533_v62 = vsel %vm530_vm10, %v532_v60, %v528_v58 }
 0x176   : > { %v548_v63 = vsel %vm545_vm9, %v547_v57, %v543_v59 }
 0x177   : > { %v552_v0 = vrot.slane %v548_v63, 4 }
 0x179   : > { %v553_v1 = vsel %vm493_vm2, %v533_v62, %v552_v0 }
 0x17a   : > { %v555_v2 = vmul.f32 %v553_v1, %v1050_v4 }
 0x17c   : > { %556 = vst [vmem:[%s204_s1] sm:$0xff] %v555_v2 }
 0x17d   : > { %856 = shalt.err (!%p853_p11)
}
 0x17e   : > { %682 = dma.vmem_to_hbm [thread:$0]  (%p1009_p3), %s572_s29, 128, %s574_s6, %s558_s8  }
 0x17f PF: > { %s585_s5 = sand.u32 1, %s887_s14   ;;  %p1228_p12 = scmp.ge.s32.totalorder %s899_s17, 2 }
 0x180   : > { %s586_s13 = scalar_lea.sflag [#allocation5], %s585_s5 }
 0x181   : > { %p693_p13 = pnand %p1228_p12, %p978_p6 }
 0x183   : > { %p694_p0 = pneg %p693_p13 }
 0x185   : > { %882 = dma.done.wait (%p694_p0), %s586_s13, 128  }
 0x186   : > { %884 = vsyncadd (%p694_p0), %s586_s13, 4294967168  ;;  %p18_p5 = scmp.ge.s32.totalorder %s996_s27, 4   ;;  %s1229_s14 = smov %s891_s15 }
 0x187   : > { %s1230_s15 = smov %s895_s16  ;;  %s1231_s16 = smov %s1005_s30 }
 0x188   : > { %s1232_s17 = smov %s996_s27  ;;  %20 = sbr.rel (!%p18_p5) target bundleno = 8 (0x8), region = 82 }
 0x18d   :  { %592 = vsyncpa [#allocation4], 1 }
 0x18e   :  { %594 = vsyncpa [#allocation4 + $0x1], 1 }
 0x18f   :  { %595 = vsyncpa [#allocation7], 1 }
 0x190   :  { %597 = vsyncpa [#allocation7 + $0x1], 1 }
 0x191   :  { %598 = vsyncpa [#allocation5], 1 }
 0x192   :  { %600 = vsyncpa [#allocation5 + $0x1], 1 }

</bundles_post_ra>
